<compile_context>
chip_gen: v5e
topology: v5e:2x2
jax: 0.10.0
libtpu: 0.0.40
codegen_flags: <defaults>
</compile_context>

<pallas_src>
import functools
from math import sqrt

import jax
import jax.numpy as jnp
from jax.experimental import pallas as pl
from jax.experimental.pallas import tpu as pltpu


def _layeratt_kernel(x_ref, w_ref, b_ref, c_ref, out_ref, *, L, Dout):
    """One grid step processes a (TB, L*Din) slab of batch rows.

    x_ref   : (TB, L*Din)       VMEM  -- TB batches, layer-major columns
    w_ref   : (L*Din, 3*L*Dout) VMEM  -- block-diagonal fused [Q | K | V] weights
    b_ref   : (1, 3*L*Dout)     VMEM  -- fused biases (norm folded into Q part)
    c_ref   : (L+1,)            SMEM  -- Conv1d weights (L) + bias (1)
    out_ref : (TB, Dout)        VMEM
    """
    LDout = L * Dout

    # Single fused projection on the MXU: M = TB, K = L*Din, N = 3*L*Dout.
    proj = jnp.dot(x_ref[...], w_ref[...],
                   preferred_element_type=jnp.float32) + b_ref[...]

    # Per-layer lane slices: layer l's Q/K/V occupy Dout-wide lane blocks.
    q = [proj[:, l * Dout:(l + 1) * Dout] for l in range(L)]
    k = [proj[:, LDout + m * Dout:LDout + (m + 1) * Dout] for m in range(L)]
    v = [proj[:, 2 * LDout + m * Dout:2 * LDout + (m + 1) * Dout]
         for m in range(L)]

    # Scores s[l][m] = <q_l, k_m> per batch row (scale already folded into q):
    # L*L broadcast-multiply + lane reductions — VPU/XLU work, MXU stays free.
    s = [[jnp.sum(q[l] * k[m], axis=-1, keepdims=True) for m in range(L)]
         for l in range(L)]

    # Softmax over the layer axis l (== torch.nn.Softmax(dim=1)) for each m,
    # fused with the Conv1d(k=1) reduction over l:
    #   beta[m] = sum_l cw[l] * softmax_l(s[:, m])     (TB, 1)
    #   out     = sum_m beta[m] * v_m + cb             (TB, Dout)
    acc = None
    for m in range(L):
        mx = s[0][m]
        for l in range(1, L):
            mx = jnp.maximum(mx, s[l][m])
        e = [jnp.exp(s[l][m] - mx) for l in range(L)]
        denom = e[0]
        num = c_ref[0] * e[0]
        for l in range(1, L):
            denom = denom + e[l]
            num = num + c_ref[l] * e[l]
        beta_m = num / denom                          # (TB, 1)
        contrib = beta_m * v[m]                       # (TB, Dout)
        acc = contrib if acc is None else acc + contrib

    out_ref[...] = acc + c_ref[L]


def layer_att(x, wq, bq, wk, bk, wv, bv, conv_w, conv_b, *, out_size,
              block_b=512):
    """x: (B, L, Din) float32 -> (B, Dout) float32."""
    B, L, Din = x.shape
    Dout = out_size
    norm = 1.0 / sqrt(Dout)

    # ---- parameter preparation (tiny, one-off XLA ops) ---------------------
    # Pre-transpose to (Din, Dout); fold the 1/sqrt(Dout) scale into Q.
    wq_t = wq.T * norm
    wk_t = wk.T
    wv_t = wv.T
    bq_f = bq * norm

    # Fused block-diagonal weight for x viewed as (B, L*Din).  Output columns
    # are laid out as [q_0..q_{L-1} | k_0..k_{L-1} | v_0..v_{L-1}], Dout each,
    # so per-layer Q/K/V are contiguous lane slices inside the kernel.
    LDin, LDout = L * Din, L * Dout
    w_big = jnp.zeros((LDin, 3 * LDout), jnp.float32)
    for l in range(L):
        rows = slice(l * Din, (l + 1) * Din)
        w_big = w_big.at[rows, l * Dout:(l + 1) * Dout].set(wq_t)
        w_big = w_big.at[rows, LDout + l * Dout:LDout + (l + 1) * Dout].set(wk_t)
        w_big = w_big.at[
            rows, 2 * LDout + l * Dout:2 * LDout + (l + 1) * Dout].set(wv_t)
    b_big = jnp.concatenate(
        [jnp.tile(bq_f, L), jnp.tile(bk, L), jnp.tile(bv, L)]
    ).reshape(1, 3 * LDout)

    # Conv1d(k=1) parameters -> (L+1,) scalar table living in SMEM.
    c_params = jnp.concatenate(
        [conv_w.reshape(-1), conv_b.reshape(-1)]).astype(jnp.float32)

    # ---- batch blocking -----------------------------------------------------
    x2 = x.reshape(B, LDin)                     # free row-major view
    TB = min(block_b, B)
    Bp = ((B + TB - 1) // TB) * TB              # pad batch to a TB multiple
    if Bp != B:
        x2 = jnp.pad(x2, ((0, Bp - B), (0, 0)))
    grid = (Bp // TB,)

    kernel = functools.partial(_layeratt_kernel, L=L, Dout=Dout)

    flops = 2 * Bp * LDin * 3 * LDout + Bp * L * L * (2 * Dout + 10)
    bytes_accessed = 4 * (Bp * LDin + Bp * Dout
                          + int(w_big.size) + int(b_big.size) + (L + 1))

    out = pl.pallas_call(
        kernel,
        out_shape=jax.ShapeDtypeStruct((Bp, Dout), jnp.float32),
        grid_spec=pltpu.PrefetchScalarGridSpec(
            num_scalar_prefetch=0,
            grid=grid,
            in_specs=[
                pl.BlockSpec((TB, LDin), lambda i: (i, 0)),         # x slab
                pl.BlockSpec((LDin, 3 * LDout), lambda i: (0, 0)),  # fused W
                pl.BlockSpec((1, 3 * LDout), lambda i: (0, 0)),     # fused bias
                pl.BlockSpec(memory_space=pltpu.MemorySpace.SMEM),  # conv params
            ],
            out_specs=pl.BlockSpec((TB, Dout), lambda i: (i, 0)),
        ),
        compiler_params=pltpu.CompilerParams(
            dimension_semantics=("parallel",),
            vmem_limit_bytes=32 * 1024 * 1024,
        ),
        cost_estimate=pl.CostEstimate(
            flops=int(flops),
            transcendentals=int(Bp * L * L),
            bytes_accessed=int(bytes_accessed),
        ),
    )(x2, w_big, b_big, c_params)

    return out[:B]


def layer_att_ref(x, wq, bq, wk, bk, wv, bv, conv_w, conv_b, *, out_size):
    """Pure-JAX reference mirroring the PyTorch forward."""
    norm = 1.0 / sqrt(out_size)
    Q = jnp.einsum("bld,od->blo", x, wq) + bq
    K = jnp.einsum("bld,od->blo", x, wk) + bk
    V = jnp.einsum("bld,od->blo", x, wv) + bv
    out = jnp.einsum("blo,bmo->blm", Q, K) * norm
    alpha = jax.nn.softmax(out, axis=1)                 # dim=1 !
    z = jnp.einsum("blm,bmo->blo", alpha, V)
    cw = conv_w.reshape(-1)                             # (L,)
    finalz = jnp.einsum("l,blo->bo", cw, z) + conv_b.reshape(())
    return finalz


if __name__ == "__main__":
    # Shapes implied by the module: x is (batch, gcnlayers+1, inSize).
    B = 2
    gcnlayers = 3
    L = gcnlayers + 1          # 4
    in_size = 16
    out_size = 32

    key = jax.random.PRNGKey(0)
    keys = jax.random.split(key, 10)

    x = jax.random.normal(keys[0], (B, L, in_size), dtype=jnp.float32)

    # Deterministic synthetic parameter init (PyTorch Linear conventions).
    sc_lin = 1.0 / sqrt(in_size)
    wq = jax.random.uniform(keys[1], (out_size, in_size), jnp.float32, -sc_lin, sc_lin)
    bq = jax.random.uniform(keys[2], (out_size,), jnp.float32, -sc_lin, sc_lin)
    wk = jax.random.uniform(keys[3], (out_size, in_size), jnp.float32, -sc_lin, sc_lin)
    bk = jax.random.uniform(keys[4], (out_size,), jnp.float32, -sc_lin, sc_lin)
    wv = jax.random.uniform(keys[5], (out_size, in_size), jnp.float32, -sc_lin, sc_lin)
    bv = jax.random.uniform(keys[6], (out_size,), jnp.float32, -sc_lin, sc_lin)

    sc_cnn = 1.0 / sqrt(L)     # Conv1d fan_in = in_channels * kernel_size = L
    conv_w = jax.random.uniform(keys[7], (1, L, 1), jnp.float32, -sc_cnn, sc_cnn)
    conv_b = jax.random.uniform(keys[8], (1,), jnp.float32, -sc_cnn, sc_cnn)

    # Small-shape correctness check (single grid step, TB == B).
    out = layer_att(x, wq, bq, wk, bk, wv, bv, conv_w, conv_b, out_size=out_size)
    out = jax.block_until_ready(out)
    ref = layer_att_ref(x, wq, bq, wk, bk, wv, bv, conv_w, conv_b, out_size=out_size)
    assert out.shape == (B, out_size), out.shape
    assert jnp.allclose(out, ref, atol=1e-4, rtol=1e-4), (out, ref)

    # Also exercise the batch-blocked, padded multi-step grid (TB=512, 3 steps).
    B2 = 1030
    x_big = jax.random.normal(keys[9], (B2, L, in_size), dtype=jnp.float32)
    out_big = layer_att(x_big, wq, bq, wk, bk, wv, bv, conv_w, conv_b,
                        out_size=out_size)
    out_big = jax.block_until_ready(out_big)
    ref_big = layer_att_ref(x_big, wq, bq, wk, bk, wv, bv, conv_w, conv_b,
                            out_size=out_size)
    assert out_big.shape == (B2, out_size), out_big.shape
    assert jnp.allclose(out_big, ref_big, atol=1e-4, rtol=1e-4)

    print("KERNEL_OK")
</pallas_src>

<mosaic_0001>
module attributes {stable_mosaic.version = 11 : i64} {
  func.func @_layeratt_kernel(%arg0: i32, %arg1: memref<2x64xf32, #tpu.memory_space<vmem>>, %arg2: memref<64x384xf32, #tpu.memory_space<vmem>>, %arg3: memref<1x384xf32, #tpu.memory_space<vmem>>, %arg4: memref<5xf32, #tpu.memory_space<smem>>, %arg5: memref<2x32xf32, #tpu.memory_space<vmem>>) attributes {dimension_semantics = [#tpu.dimension_semantics<parallel>], iteration_bounds = array<i64: 1>, scalar_prefetch = 0 : i64, scratch_operands = 0 : i64, tpu.core_type = #tpu.core_type<tc>, window_params = [{transform_indices = @transform_0, window_bounds = array<i64: 2, 64>}, {pipeline_mode = #tpu.pipeline_mode<synchronous>, transform_indices = @transform_1, window_bounds = array<i64: 64, 384>}, {pipeline_mode = #tpu.pipeline_mode<synchronous>, transform_indices = @transform_2, window_bounds = array<i64: 1, 384>}, {transform_indices = @transform_3, window_bounds = array<i64: 5>}, {transform_indices = @transform_4, window_bounds = array<i64: 2, 32>}]} {
    %c0 = arith.constant 0 : index
    %c0_0 = arith.constant 0 : index
    %0 = vector.load %arg1[%c0, %c0_0] : memref<2x64xf32, #tpu.memory_space<vmem>>, vector<2x64xf32>
    %c0_1 = arith.constant 0 : index
    %c0_2 = arith.constant 0 : index
    %1 = vector.load %arg2[%c0_1, %c0_2] : memref<64x384xf32, #tpu.memory_space<vmem>>, vector<64x384xf32>
    %cst = arith.constant dense<0.000000e+00> : vector<2x384xf32>
    %2 = tpu.matmul %0, %1, %cst {dimension_numbers = #tpu.dot_dimension_numbers<[1], [0], [0], [1], [0, 0, 1, 1], [], []>} : vector<2x64xf32>, vector<64x384xf32>, vector<2x384xf32> -> vector<2x384xf32>
    %c0_3 = arith.constant 0 : index
    %c0_4 = arith.constant 0 : index
    %3 = vector.load %arg3[%c0_3, %c0_4] : memref<1x384xf32, #tpu.memory_space<vmem>>, vector<1x384xf32>
    %4 = vector.broadcast %3 : vector<1x384xf32> to vector<2x384xf32>
    %5 = arith.addf %2, %4 : vector<2x384xf32>
    %6 = vector.extract_strided_slice %5 {offsets = [0, 0], sizes = [2, 32], strides = [1, 1]} : vector<2x384xf32> to vector<2x32xf32>
    %7 = vector.extract_strided_slice %5 {offsets = [0, 32], sizes = [2, 32], strides = [1, 1]} : vector<2x384xf32> to vector<2x32xf32>
    %8 = vector.extract_strided_slice %5 {offsets = [0, 64], sizes = [2, 32], strides = [1, 1]} : vector<2x384xf32> to vector<2x32xf32>
    %9 = vector.extract_strided_slice %5 {offsets = [0, 96], sizes = [2, 32], strides = [1, 1]} : vector<2x384xf32> to vector<2x32xf32>
    %10 = vector.extract_strided_slice %5 {offsets = [0, 128], sizes = [2, 32], strides = [1, 1]} : vector<2x384xf32> to vector<2x32xf32>
    %11 = vector.extract_strided_slice %5 {offsets = [0, 160], sizes = [2, 32], strides = [1, 1]} : vector<2x384xf32> to vector<2x32xf32>
    %12 = vector.extract_strided_slice %5 {offsets = [0, 192], sizes = [2, 32], strides = [1, 1]} : vector<2x384xf32> to vector<2x32xf32>
    %13 = vector.extract_strided_slice %5 {offsets = [0, 224], sizes = [2, 32], strides = [1, 1]} : vector<2x384xf32> to vector<2x32xf32>
    %14 = vector.extract_strided_slice %5 {offsets = [0, 256], sizes = [2, 32], strides = [1, 1]} : vector<2x384xf32> to vector<2x32xf32>
    %15 = vector.extract_strided_slice %5 {offsets = [0, 288], sizes = [2, 32], strides = [1, 1]} : vector<2x384xf32> to vector<2x32xf32>
    %16 = vector.extract_strided_slice %5 {offsets = [0, 320], sizes = [2, 32], strides = [1, 1]} : vector<2x384xf32> to vector<2x32xf32>
    %17 = vector.extract_strided_slice %5 {offsets = [0, 352], sizes = [2, 32], strides = [1, 1]} : vector<2x384xf32> to vector<2x32xf32>
    %18 = arith.mulf %6, %10 : vector<2x32xf32>
    %cst_5 = arith.constant dense<0.000000e+00> : vector<2xf32>
    %19 = vector.multi_reduction <add>, %18, %cst_5 [1] : vector<2x32xf32> to vector<2xf32>
    %20 = vector.shape_cast %19 : vector<2xf32> to vector<2x1xf32>
    %21 = arith.mulf %6, %11 : vector<2x32xf32>
    %cst_6 = arith.constant dense<0.000000e+00> : vector<2xf32>
    %22 = vector.multi_reduction <add>, %21, %cst_6 [1] : vector<2x32xf32> to vector<2xf32>
    %23 = vector.shape_cast %22 : vector<2xf32> to vector<2x1xf32>
    %24 = arith.mulf %6, %12 : vector<2x32xf32>
    %cst_7 = arith.constant dense<0.000000e+00> : vector<2xf32>
    %25 = vector.multi_reduction <add>, %24, %cst_7 [1] : vector<2x32xf32> to vector<2xf32>
    %26 = vector.shape_cast %25 : vector<2xf32> to vector<2x1xf32>
    %27 = arith.mulf %6, %13 : vector<2x32xf32>
    %cst_8 = arith.constant dense<0.000000e+00> : vector<2xf32>
    %28 = vector.multi_reduction <add>, %27, %cst_8 [1] : vector<2x32xf32> to vector<2xf32>
    %29 = vector.shape_cast %28 : vector<2xf32> to vector<2x1xf32>
    %30 = arith.mulf %7, %10 : vector<2x32xf32>
    %cst_9 = arith.constant dense<0.000000e+00> : vector<2xf32>
    %31 = vector.multi_reduction <add>, %30, %cst_9 [1] : vector<2x32xf32> to vector<2xf32>
    %32 = vector.shape_cast %31 : vector<2xf32> to vector<2x1xf32>
    %33 = arith.mulf %7, %11 : vector<2x32xf32>
    %cst_10 = arith.constant dense<0.000000e+00> : vector<2xf32>
    %34 = vector.multi_reduction <add>, %33, %cst_10 [1] : vector<2x32xf32> to vector<2xf32>
    %35 = vector.shape_cast %34 : vector<2xf32> to vector<2x1xf32>
    %36 = arith.mulf %7, %12 : vector<2x32xf32>
    %cst_11 = arith.constant dense<0.000000e+00> : vector<2xf32>
    %37 = vector.multi_reduction <add>, %36, %cst_11 [1] : vector<2x32xf32> to vector<2xf32>
    %38 = vector.shape_cast %37 : vector<2xf32> to vector<2x1xf32>
    %39 = arith.mulf %7, %13 : vector<2x32xf32>
    %cst_12 = arith.constant dense<0.000000e+00> : vector<2xf32>
    %40 = vector.multi_reduction <add>, %39, %cst_12 [1] : vector<2x32xf32> to vector<2xf32>
    %41 = vector.shape_cast %40 : vector<2xf32> to vector<2x1xf32>
    %42 = arith.mulf %8, %10 : vector<2x32xf32>
    %cst_13 = arith.constant dense<0.000000e+00> : vector<2xf32>
    %43 = vector.multi_reduction <add>, %42, %cst_13 [1] : vector<2x32xf32> to vector<2xf32>
    %44 = vector.shape_cast %43 : vector<2xf32> to vector<2x1xf32>
    %45 = arith.mulf %8, %11 : vector<2x32xf32>
    %cst_14 = arith.constant dense<0.000000e+00> : vector<2xf32>
    %46 = vector.multi_reduction <add>, %45, %cst_14 [1] : vector<2x32xf32> to vector<2xf32>
    %47 = vector.shape_cast %46 : vector<2xf32> to vector<2x1xf32>
    %48 = arith.mulf %8, %12 : vector<2x32xf32>
    %cst_15 = arith.constant dense<0.000000e+00> : vector<2xf32>
    %49 = vector.multi_reduction <add>, %48, %cst_15 [1] : vector<2x32xf32> to vector<2xf32>
    %50 = vector.shape_cast %49 : vector<2xf32> to vector<2x1xf32>
    %51 = arith.mulf %8, %13 : vector<2x32xf32>
    %cst_16 = arith.constant dense<0.000000e+00> : vector<2xf32>
    %52 = vector.multi_reduction <add>, %51, %cst_16 [1] : vector<2x32xf32> to vector<2xf32>
    %53 = vector.shape_cast %52 : vector<2xf32> to vector<2x1xf32>
    %54 = arith.mulf %9, %10 : vector<2x32xf32>
    %cst_17 = arith.constant dense<0.000000e+00> : vector<2xf32>
    %55 = vector.multi_reduction <add>, %54, %cst_17 [1] : vector<2x32xf32> to vector<2xf32>
    %56 = vector.shape_cast %55 : vector<2xf32> to vector<2x1xf32>
    %57 = arith.mulf %9, %11 : vector<2x32xf32>
    %cst_18 = arith.constant dense<0.000000e+00> : vector<2xf32>
    %58 = vector.multi_reduction <add>, %57, %cst_18 [1] : vector<2x32xf32> to vector<2xf32>
    %59 = vector.shape_cast %58 : vector<2xf32> to vector<2x1xf32>
    %60 = arith.mulf %9, %12 : vector<2x32xf32>
    %cst_19 = arith.constant dense<0.000000e+00> : vector<2xf32>
    %61 = vector.multi_reduction <add>, %60, %cst_19 [1] : vector<2x32xf32> to vector<2xf32>
    %62 = vector.shape_cast %61 : vector<2xf32> to vector<2x1xf32>
    %63 = arith.mulf %9, %13 : vector<2x32xf32>
    %cst_20 = arith.constant dense<0.000000e+00> : vector<2xf32>
    %64 = vector.multi_reduction <add>, %63, %cst_20 [1] : vector<2x32xf32> to vector<2xf32>
    %65 = vector.shape_cast %64 : vector<2xf32> to vector<2x1xf32>
    %66 = arith.maximumf %20, %32 : vector<2x1xf32>
    %67 = arith.maximumf %66, %44 : vector<2x1xf32>
    %68 = arith.maximumf %67, %56 : vector<2x1xf32>
    %69 = arith.subf %20, %68 : vector<2x1xf32>
    %70 = math.exp %69 : vector<2x1xf32>
    %71 = arith.subf %32, %68 : vector<2x1xf32>
    %72 = math.exp %71 : vector<2x1xf32>
    %73 = arith.subf %44, %68 : vector<2x1xf32>
    %74 = math.exp %73 : vector<2x1xf32>
    %75 = arith.subf %56, %68 : vector<2x1xf32>
    %76 = math.exp %75 : vector<2x1xf32>
    %c0_21 = arith.constant 0 : index
    %77 = memref.load %arg4[%c0_21] : memref<5xf32, #tpu.memory_space<smem>>
    %78 = vector.broadcast %77 : f32 to vector<2x1xf32>
    %79 = arith.mulf %78, %70 : vector<2x1xf32>
    %80 = arith.addf %70, %72 : vector<2x1xf32>
    %c1 = arith.constant 1 : index
    %81 = memref.load %arg4[%c1] : memref<5xf32, #tpu.memory_space<smem>>
    %82 = vector.broadcast %81 : f32 to vector<2x1xf32>
    %83 = arith.mulf %82, %72 : vector<2x1xf32>
    %84 = arith.addf %79, %83 : vector<2x1xf32>
    %85 = arith.addf %80, %74 : vector<2x1xf32>
    %c2 = arith.constant 2 : index
    %86 = memref.load %arg4[%c2] : memref<5xf32, #tpu.memory_space<smem>>
    %87 = vector.broadcast %86 : f32 to vector<2x1xf32>
    %88 = arith.mulf %87, %74 : vector<2x1xf32>
    %89 = arith.addf %84, %88 : vector<2x1xf32>
    %90 = arith.addf %85, %76 : vector<2x1xf32>
    %c3 = arith.constant 3 : index
    %91 = memref.load %arg4[%c3] : memref<5xf32, #tpu.memory_space<smem>>
    %92 = vector.broadcast %91 : f32 to vector<2x1xf32>
    %93 = arith.mulf %92, %76 : vector<2x1xf32>
    %94 = arith.addf %89, %93 : vector<2x1xf32>
    %95 = arith.divf %94, %90 : vector<2x1xf32>
    %96 = vector.broadcast %95 : vector<2x1xf32> to vector<2x32xf32>
    %97 = arith.mulf %96, %14 : vector<2x32xf32>
    %98 = arith.maximumf %23, %35 : vector<2x1xf32>
    %99 = arith.maximumf %98, %47 : vector<2x1xf32>
    %100 = arith.maximumf %99, %59 : vector<2x1xf32>
    %101 = arith.subf %23, %100 : vector<2x1xf32>
    %102 = math.exp %101 : vector<2x1xf32>
    %103 = arith.subf %35, %100 : vector<2x1xf32>
    %104 = math.exp %103 : vector<2x1xf32>
    %105 = arith.subf %47, %100 : vector<2x1xf32>
    %106 = math.exp %105 : vector<2x1xf32>
    %107 = arith.subf %59, %100 : vector<2x1xf32>
    %108 = math.exp %107 : vector<2x1xf32>
    %c0_22 = arith.constant 0 : index
    %109 = memref.load %arg4[%c0_22] : memref<5xf32, #tpu.memory_space<smem>>
    %110 = vector.broadcast %109 : f32 to vector<2x1xf32>
    %111 = arith.mulf %110, %102 : vector<2x1xf32>
    %112 = arith.addf %102, %104 : vector<2x1xf32>
    %c1_23 = arith.constant 1 : index
    %113 = memref.load %arg4[%c1_23] : memref<5xf32, #tpu.memory_space<smem>>
    %114 = vector.broadcast %113 : f32 to vector<2x1xf32>
    %115 = arith.mulf %114, %104 : vector<2x1xf32>
    %116 = arith.addf %111, %115 : vector<2x1xf32>
    %117 = arith.addf %112, %106 : vector<2x1xf32>
    %c2_24 = arith.constant 2 : index
    %118 = memref.load %arg4[%c2_24] : memref<5xf32, #tpu.memory_space<smem>>
    %119 = vector.broadcast %118 : f32 to vector<2x1xf32>
    %120 = arith.mulf %119, %106 : vector<2x1xf32>
    %121 = arith.addf %116, %120 : vector<2x1xf32>
    %122 = arith.addf %117, %108 : vector<2x1xf32>
    %c3_25 = arith.constant 3 : index
    %123 = memref.load %arg4[%c3_25] : memref<5xf32, #tpu.memory_space<smem>>
    %124 = vector.broadcast %123 : f32 to vector<2x1xf32>
    %125 = arith.mulf %124, %108 : vector<2x1xf32>
    %126 = arith.addf %121, %125 : vector<2x1xf32>
    %127 = arith.divf %126, %122 : vector<2x1xf32>
    %128 = vector.broadcast %127 : vector<2x1xf32> to vector<2x32xf32>
    %129 = arith.mulf %128, %15 : vector<2x32xf32>
    %130 = arith.addf %97, %129 : vector<2x32xf32>
    %131 = arith.maximumf %26, %38 : vector<2x1xf32>
    %132 = arith.maximumf %131, %50 : vector<2x1xf32>
    %133 = arith.maximumf %132, %62 : vector<2x1xf32>
    %134 = arith.subf %26, %133 : vector<2x1xf32>
    %135 = math.exp %134 : vector<2x1xf32>
    %136 = arith.subf %38, %133 : vector<2x1xf32>
    %137 = math.exp %136 : vector<2x1xf32>
    %138 = arith.subf %50, %133 : vector<2x1xf32>
    %139 = math.exp %138 : vector<2x1xf32>
    %140 = arith.subf %62, %133 : vector<2x1xf32>
    %141 = math.exp %140 : vector<2x1xf32>
    %c0_26 = arith.constant 0 : index
    %142 = memref.load %arg4[%c0_26] : memref<5xf32, #tpu.memory_space<smem>>
    %143 = vector.broadcast %142 : f32 to vector<2x1xf32>
    %144 = arith.mulf %143, %135 : vector<2x1xf32>
    %145 = arith.addf %135, %137 : vector<2x1xf32>
    %c1_27 = arith.constant 1 : index
    %146 = memref.load %arg4[%c1_27] : memref<5xf32, #tpu.memory_space<smem>>
    %147 = vector.broadcast %146 : f32 to vector<2x1xf32>
    %148 = arith.mulf %147, %137 : vector<2x1xf32>
    %149 = arith.addf %144, %148 : vector<2x1xf32>
    %150 = arith.addf %145, %139 : vector<2x1xf32>
    %c2_28 = arith.constant 2 : index
    %151 = memref.load %arg4[%c2_28] : memref<5xf32, #tpu.memory_space<smem>>
    %152 = vector.broadcast %151 : f32 to vector<2x1xf32>
    %153 = arith.mulf %152, %139 : vector<2x1xf32>
    %154 = arith.addf %149, %153 : vector<2x1xf32>
    %155 = arith.addf %150, %141 : vector<2x1xf32>
    %c3_29 = arith.constant 3 : index
    %156 = memref.load %arg4[%c3_29] : memref<5xf32, #tpu.memory_space<smem>>
    %157 = vector.broadcast %156 : f32 to vector<2x1xf32>
    %158 = arith.mulf %157, %141 : vector<2x1xf32>
    %159 = arith.addf %154, %158 : vector<2x1xf32>
    %160 = arith.divf %159, %155 : vector<2x1xf32>
    %161 = vector.broadcast %160 : vector<2x1xf32> to vector<2x32xf32>
    %162 = arith.mulf %161, %16 : vector<2x32xf32>
    %163 = arith.addf %130, %162 : vector<2x32xf32>
    %164 = arith.maximumf %29, %41 : vector<2x1xf32>
    %165 = arith.maximumf %164, %53 : vector<2x1xf32>
    %166 = arith.maximumf %165, %65 : vector<2x1xf32>
    %167 = arith.subf %29, %166 : vector<2x1xf32>
    %168 = math.exp %167 : vector<2x1xf32>
    %169 = arith.subf %41, %166 : vector<2x1xf32>
    %170 = math.exp %169 : vector<2x1xf32>
    %171 = arith.subf %53, %166 : vector<2x1xf32>
    %172 = math.exp %171 : vector<2x1xf32>
    %173 = arith.subf %65, %166 : vector<2x1xf32>
    %174 = math.exp %173 : vector<2x1xf32>
    %c0_30 = arith.constant 0 : index
    %175 = memref.load %arg4[%c0_30] : memref<5xf32, #tpu.memory_space<smem>>
    %176 = vector.broadcast %175 : f32 to vector<2x1xf32>
    %177 = arith.mulf %176, %168 : vector<2x1xf32>
    %178 = arith.addf %168, %170 : vector<2x1xf32>
    %c1_31 = arith.constant 1 : index
    %179 = memref.load %arg4[%c1_31] : memref<5xf32, #tpu.memory_space<smem>>
    %180 = vector.broadcast %179 : f32 to vector<2x1xf32>
    %181 = arith.mulf %180, %170 : vector<2x1xf32>
    %182 = arith.addf %177, %181 : vector<2x1xf32>
    %183 = arith.addf %178, %172 : vector<2x1xf32>
    %c2_32 = arith.constant 2 : index
    %184 = memref.load %arg4[%c2_32] : memref<5xf32, #tpu.memory_space<smem>>
    %185 = vector.broadcast %184 : f32 to vector<2x1xf32>
    %186 = arith.mulf %185, %172 : vector<2x1xf32>
    %187 = arith.addf %182, %186 : vector<2x1xf32>
    %188 = arith.addf %183, %174 : vector<2x1xf32>
    %c3_33 = arith.constant 3 : index
    %189 = memref.load %arg4[%c3_33] : memref<5xf32, #tpu.memory_space<smem>>
    %190 = vector.broadcast %189 : f32 to vector<2x1xf32>
    %191 = arith.mulf %190, %174 : vector<2x1xf32>
    %192 = arith.addf %187, %191 : vector<2x1xf32>
    %193 = arith.divf %192, %188 : vector<2x1xf32>
    %194 = vector.broadcast %193 : vector<2x1xf32> to vector<2x32xf32>
    %195 = arith.mulf %194, %17 : vector<2x32xf32>
    %196 = arith.addf %163, %195 : vector<2x32xf32>
    %c4 = arith.constant 4 : index
    %197 = memref.load %arg4[%c4] : memref<5xf32, #tpu.memory_space<smem>>
    %198 = vector.broadcast %197 : f32 to vector<2x32xf32>
    %199 = arith.addf %196, %198 : vector<2x32xf32>
    %c0_34 = arith.constant 0 : index
    %c0_35 = arith.constant 0 : index
    %200 = vector.load %arg5[%c0_34, %c0_35] : memref<2x32xf32, #tpu.memory_space<vmem>>, vector<2x32xf32>
    tpu.vector_store %arg5[%c0_34, %c0_35], %199 {strides = array<i32>} : memref<2x32xf32, #tpu.memory_space<vmem>>, vector<2x32xf32>,
    return
  }
  func.func @transform_0(%arg0: i32) -> (i32, i32) {
    %c0_i32 = arith.constant 0 : i32
    %c0_i32_0 = arith.constant 0 : i32
    return %arg0, %c0_i32 : i32, i32
  }
  func.func @transform_1(%arg0: i32) -> (i32, i32) {
    %c0_i32 = arith.constant 0 : i32
    %c0_i32_0 = arith.constant 0 : i32
    %c0_i32_1 = arith.constant 0 : i32
    return %c0_i32, %c0_i32_0 : i32, i32
  }
  func.func @transform_2(%arg0: i32) -> (i32, i32) {
    %c0_i32 = arith.constant 0 : i32
    %c0_i32_0 = arith.constant 0 : i32
    %c0_i32_1 = arith.constant 0 : i32
    return %c0_i32, %c0_i32_0 : i32, i32
  }
  func.func @transform_3(%arg0: i32) -> i32 {
    %c0_i32 = arith.constant 0 : i32
    %c0_i32_0 = arith.constant 0 : i32
    return %c0_i32 : i32
  }
  func.func @transform_4(%arg0: i32) -> (i32, i32) {
    %c0_i32 = arith.constant 0 : i32
    %c0_i32_0 = arith.constant 0 : i32
    return %arg0, %c0_i32 : i32, i32
  }
}

</mosaic_0001>

<bundles_post_ra>
// kernel: tpu_custom_call.1
= control target key start
LH: loop header
LB: loop body
LE: loop exit
PB: predicated region body
PF: predicated region fallthrough
CT: control target
= control target key end

     0   :  { %9 = vsyncpa [#allocation3], 0  ;;  %s856_s0 = inlined_call_operand.hbm [shape: f32[2,64], index: 0, kind: input, shape index: {}]   ;;  %s857_s1 = inlined_call_operand.hbm [shape: f32[64,384], index: 1, kind: input, shape index: {}]   ;;  %s858_s2 = inlined_call_operand.hbm [shape: f32[1,384], index: 2, kind: input, shape index: {}]   ;;  %s859_s3 = inlined_call_operand.vmem [shape: f32[5], index: 3, kind: input, shape index: {}]   ;;  %s860_s4 = inlined_call_operand.hbm [shape: f32[2,32], index: 4, kind: output, shape index: {}]  }
   0x1   :  { %10 = vsyncpa [#allocation7], 0 }
   0x2   :  { %11 = vsyncpa [#allocation5], 0  ;;  %s28_s17 = sshll.u32 %s857_s1, 4  ;;  %s29_s17 = int_to_ptr.hbm [resolvable:$true] %s28_s17 }
   0x3   :  { %12 = vsyncpa [#allocation4], 0  ;;  %s657_s18 = smov [#allocation6]   ;;  %s18_s22 = sshll.u32 %s856_s0, 4  ;;  %s19_s22 = int_to_ptr.hbm [resolvable:$true] %s18_s22 }
   0x4   :  { %s30_s19 = sshll.u32 %s657_s18, 4  ;;  %s658_s23 = smov 384   ;;  %s31_s19 = int_to_ptr.vmem [resolvable:$true] %s30_s19 }
   0x5   :  { %s659_s24 = smov 24   ;;  %s660_s25 = smov [#allocation2]  }
   0x6   :  { %36 = dma.hbm_to_vmem [thread:$0]  %s29_s17, 3072, %s31_s19, [#allocation7], %s658_s23, %s658_s23, %s659_s24  }
   0x7   :  { %s20_s26 = sshll.u32 %s660_s25, 4  ;;  %s42_s29 = sshll.u32 %s858_s2, 4  ;;  %s21_s26 = int_to_ptr.vmem [resolvable:$true] %s20_s26  ;;  %s43_s29 = int_to_ptr.hbm [resolvable:$true] %s42_s29 }
   0x8   :  { %23 = dma.hbm_to_vmem [thread:$0]  %s19_s22, 32, %s21_s26, [#allocation3]  }
   0x9   :  { %s53_s5 = sshll.u32 %s859_s3, 4  ;;  %s661_s6 = smov [#allocation8]   ;;  %s54_s5 = int_to_ptr.vmem [resolvable:$true] %s53_s5 }
   0xa   :  { %s44_s7 = sshll.u32 %s661_s6, 4  ;;  %s662_s0 = smov [#allocation9]   ;;  %s45_s7 = int_to_ptr.vmem [resolvable:$true] %s44_s7 }
   0xb   :  { %47 = dma.hbm_to_vmem [thread:$0]  %s43_s29, 48, %s45_s7, [#allocation7]  }
   0xc   :  { %56 = dma.vmem_to_smem %s54_s5, 16, %s662_s0, [#allocation5]  }
   0xd   :  { %649 = dma.done.wait [#allocation3], 32  }
   0xe   :  { %650 = vsyncadd [#allocation3], 4294967264 }
   0xf   :  { %651 = dma.done.wait [#allocation7], 3120  }
  0x10   :  { %652 = vsyncadd [#allocation7], 4294964176 }
  0x11   :  { %653 = dma.done.wait [#allocation5], 16  }
  0x12   :  { %654 = vsyncadd [#allocation5], 4294967280 }
  0x13   :  { %73 = sfence }
  0x14   :  { %v96_v0 = vld [vmem:[#allocation6 + $0xa8] sm:$0xff]  ;;  %v97_v1 = vld [vmem:[#allocation6 + $0xb0] sm:$0xff]  ;;  %v94_v3 = vld [vmem:[#allocation6 + $0x98] sm:$0xff]  ;;  %vm107_vm0 = vcmask 523264   ;;  %s663_s2 = smov 32   ;;  %s664_s3 = smov 64  }
  0x15   :  { %v93_v2 = vld [vmem:[#allocation6 + $0x90] sm:$0xff]  ;;  %119 = vmatpush.msra.mxu0 %v96_v0  ;;  %139 = vmatpush.msra.mxu1 %v97_v1  ;;  %v90_v4 = vld [vmem:[#allocation6 + $0x78] sm:$0xff]  ;;  %v91_v5 = vld [vmem:[#allocation6 + $0x80] sm:$0xff]  ;;  %s665_s8 = smov 96   ;;  %vm172_vm1 = vcmask 254976   ;;  %s761_s9 = sld [smem:[#allocation9 + $0x3]] }
  0x16   :  { %v87_v6 = vld [vmem:[#allocation6 + $0x60] sm:$0xff]  ;;  %v88_v7 = vld [vmem:[#allocation6 + $0x68] sm:$0xff]  ;;  %v85_v9 = vld [vmem:[#allocation6 + $0x50] sm:$0xff]  ;;  %s765_s10 = sld [smem:[#allocation9]]  ;;  %s666_s14 = smov [#allocation10]  }
  0x17   :  { %120 = vmatpush.msra.mxu0 %v93_v2  ;;  %140 = vmatpush.msra.mxu1 %v94_v3  ;;  %v84_v8 = vld [vmem:[#allocation6 + $0x48] sm:$0xff]  ;;  %v81_v10 = vld [vmem:[#allocation6 + $0x30] sm:$0xff]  ;;  %v82_v11 = vld [vmem:[#allocation6 + $0x38] sm:$0xff]  ;;  %s767_s11 = sld [smem:[#allocation9 + $0x1]]  ;;  %s470_s15 = sshll.u32 %s666_s14, 4  ;;  %s471_s15 = int_to_ptr.vmem [resolvable:$true] %s470_s15 }
  0x18   :  { %v78_v12 = vld [vmem:[#allocation6 + $0x18] sm:$0xff]  ;;  %v79_v13 = vld [vmem:[#allocation6 + $0x20] sm:$0xff]  ;;  %v76_v15 = vld [vmem:[#allocation6 + $0x8] sm:$0xff]  ;;  %s770_s12 = sld [smem:[#allocation9 + $0x2]]  ;;  %s472_s18 = sshll.u32 %s860_s4, 4  ;;  %s473_s18 = int_to_ptr.hbm [resolvable:$true] %s472_s18 }
  0x19   :  { %121 = vmatpush.msra.mxu0 %v90_v4  ;;  %141 = vmatpush.msra.mxu1 %v91_v5  ;;  %v75_v14 = vld [vmem:[#allocation6] sm:$0xff]  ;;  %v704_v16 = vld [vmem:[#allocation2] sm:$0x3]  ;;  %v92_v49 = vld [vmem:[#allocation6 + $0x88] sm:$0xff]  ;;  %s490_s13 = sld [smem:[#allocation9 + $0x4]] }
  0x1a   :  { %v710_v17 = vld [vmem:[#allocation8] sm:$0x7]  ;;  %v98_v43 = vld [vmem:[#allocation6 + $0xb8] sm:$0xff]  ;;  %v89_v50 = vld [vmem:[#allocation6 + $0x70] sm:$0xff] }
  0x1b   :  { %122 = vmatpush.msra.mxu0 %v87_v6  ;;  %142 = vmatpush.msra.mxu1 %v88_v7  ;;  %v102_v18 = vperm.slane %v710_v17, 1  ;;  %v101_v20 = vperm.slane %v710_v17, 0  ;;  %v95_v47 = vld [vmem:[#allocation6 + $0xa0] sm:$0xff]  ;;  %v86_v51 = vld [vmem:[#allocation6 + $0x58] sm:$0xff]  ;;  %v80_v55 = vld [vmem:[#allocation6 + $0x28] sm:$0xff] }
  0x1c   :  { %159 = vmatpush.msra.mxu2 %v98_v43  ;;  %v83_v52 = vld [vmem:[#allocation6 + $0x40] sm:$0xff]  ;;  %v77_v56 = vld [vmem:[#allocation6 + $0x10] sm:$0xff] }
  0x1d   :  { %123 = vmatpush.msra.mxu0 %v84_v8  ;;  %143 = vmatpush.msra.mxu1 %v85_v9 }
  0x1e   :  { %160 = vmatpush.msra.mxu2 %v95_v47 }
  0x1f   :  { %124 = vmatpush.msra.mxu0 %v81_v10  ;;  %144 = vmatpush.msra.mxu1 %v82_v11 }
  0x20   :  { %161 = vmatpush.msra.mxu2 %v92_v49 }
  0x21   :  { %125 = vmatpush.msra.mxu0 %v78_v12  ;;  %145 = vmatpush.msra.mxu1 %v79_v13 }
  0x22   :  { %162 = vmatpush.msra.mxu2 %v89_v50 }
  0x23   :  { %126 = vmatpush.msra.mxu0 %v75_v14  ;;  %146 = vmatpush.msra.mxu1 %v76_v15 }
  0x24   :  { %484 = vmatmul.msk.f32.vlgmr.msra.gmra.mxu0 %vm107_vm0, %v704_v16  ;;  %485 = vmatmul.msk.f32.vlgmr.msra.gmra.mxu1 %vm107_vm0, %v704_v16 }
  0x25   :  { %163 = vmatpush.msra.mxu2 %v86_v51 }
  0x27   :  { %164 = vmatpush.msra.mxu2 %v83_v52 }
  0x29   :  { %165 = vmatpush.msra.mxu2 %v80_v55 }
  0x2b   :  { %166 = vmatpush.msra.mxu2 %v77_v56 }
  0x2c   :  { %486 = vmatmul.msk.f32.vlgmr.msra.gmra.mxu2 %vm107_vm0, %v704_v16 }
  0xa1   :  { %v148_v19 = vpop.f32.mrf.mxu1  ;;  %v128_v22 = vpop.f32.mrf.mxu0 }
  0xa2   :  { %v149_v21 = vadd.f32 %v148_v19, %v102_v18  ;;  %v129_v23 = vadd.f32 %v128_v22, %v101_v20 }
  0xa4   :  { %191 = vrot.lane.b32.xlu2 %v149_v21, %s663_s2  ;;  %184 = vrot.lane.b32.xlu1 %v149_v21, %s664_s3  ;;  %v171_v24 = vmul.f32 %v149_v21, %v129_v23 }
  0xa5   :  { %177 = vrot.lane.b32.xlu0 %v149_v21, %s665_s8 }
  0xa6   :  { %v173_v25 = vsel %vm172_vm1, %v171_v24, 0.0 }
  0xac   :  { %268 = vrot.lane.b32.xlu1 %v171_v24, %s663_s2  ;;  %206 = vrot.lane.b32.xlu2 %v171_v24, %s665_s8 }
  0xb4   :  { %238 = vrot.lane.b32.xlu2 %v171_v24, %s664_s3 }
  0xcf   :  { %174 = vadd.xlane.f32.xlu0 %v173_v25 }
  0xfe   :  { %v192_v26 = vpop.permute.xlu2 %191 }
  0xff   :  { %v194_v27 = vmul.f32 %v192_v26, %v129_v23 }
 0x101   :  { %199 = vrot.lane.b32.xlu2 %v194_v27, %s665_s8  ;;  %v195_v40 = vsel %vm172_vm1, %v194_v27, 0.0 }
 0x106   :  { %v207_v33 = vpop.permute.xlu2 %206 }
 0x107   :  { %v209_v34 = vsel %vm172_vm1, %v207_v33, 0.0 }
 0x10e   :  { %v239_v35 = vpop.permute.xlu2 %238 }
 0x10f   :  { %v241_v36 = vsel %vm172_vm1, %v239_v35, 0.0 }
 0x116   :  { %v185_v28 = vpop.permute.xlu1 %184 }
 0x117   :  { %v187_v29 = vmul.f32 %v185_v28, %v129_v23  ;;  %v178_v30 = vpop.permute.xlu0 %177 }
 0x118   :  { %v180_v31 = vmul.f32 %v178_v30, %v129_v23 }
 0x119   :  { %220 = vrot.lane.b32.xlu1 %v187_v29, %s665_s8  ;;  %v188_v32 = vsel %vm172_vm1, %v187_v29, 0.0 }
 0x11a   :  { %213 = vrot.lane.b32.xlu0 %v180_v31, %s665_s8  ;;  %v181_v37 = vsel %vm172_vm1, %v180_v31, 0.0 }
 0x11e   :  { %v269_v41 = vpop.permute.xlu1 %268 }
 0x11f   :  { %v271_v1 = vsel %vm172_vm1, %v269_v41, 0.0 }
 0x121   :  { %244 = vrot.lane.b32.xlu1 %v180_v31, %s664_s3 }
 0x122   :  { %226 = vrot.lane.b32.xlu0 %v187_v29, %s664_s3 }
 0x129   :  { %250 = vrot.lane.b32.xlu1 %v180_v31, %s663_s2 }
 0x12a   :  { %232 = vrot.lane.b32.xlu0 %v194_v27, %s664_s3  ;;  %189 = vadd.xlane.f32.xlu2 %v188_v32 }
 0x132   :  { %256 = vrot.lane.b32.xlu0 %v187_v29, %s663_s2  ;;  %210 = vadd.xlane.f32.xlu2 %v209_v34 }
 0x13a   :  { %262 = vrot.lane.b32.xlu0 %v194_v27, %s663_s2  ;;  %242 = vadd.xlane.f32.xlu2 %v241_v36 }
 0x142   :  { %v736_v42 = vpop.xlane.xlu0 %174 }
 0x153   :  { %182 = vadd.xlane.f32.xlu1 %v181_v37 }
 0x15b   :  { %v200_v38 = vpop.permute.xlu2 %199 }
 0x15c   :  { %v202_v39 = vsel %vm172_vm1, %v200_v38, 0.0 }
 0x15d   :  { %203 = vadd.xlane.f32.xlu1 %v202_v39 }
 0x164   :  { %196 = vadd.xlane.f32.xlu0 %v195_v40 }
 0x18b   :  { %v221_v44 = vpop.permute.xlu1 %220 }
 0x18c   :  { %v214_v45 = vpop.permute.xlu0 %213  ;;  %v223_v46 = vsel %vm172_vm1, %v221_v44, 0.0 }
 0x18d   :  { %224 = vadd.xlane.f32.xlu2 %v223_v46  ;;  %v216_v48 = vsel %vm172_vm1, %v214_v45, 0.0 }
 0x18e   :  { %217 = vadd.xlane.f32.xlu1 %v216_v48 }
 0x193   :  { %v245_v59 = vpop.permute.xlu1 %244 }
 0x194   :  { %v227_v53 = vpop.permute.xlu0 %226  ;;  %v247_v61 = vsel %vm172_vm1, %v245_v59, 0.0 }
 0x195   :  { %v229_v54 = vsel %vm172_vm1, %v227_v53, 0.0 }
 0x196   :  { %230 = vadd.xlane.f32.xlu2 %v229_v54 }
 0x19b   :  { %v251_v63 = vpop.permute.xlu1 %250 }
 0x19c   :  { %v233_v57 = vpop.permute.xlu0 %232  ;;  %v253_v2 = vsel %vm172_vm1, %v251_v63, 0.0 }
 0x19d   :  { %v235_v58 = vsel %vm172_vm1, %v233_v57, 0.0  ;;  %v190_v4 = vpop.xlane.xlu2 %189 }
 0x19e   :  { %236 = vadd.xlane.f32.xlu0 %v235_v58 }
 0x1a4   :  { %v257_v60 = vpop.permute.xlu0 %256 }
 0x1a5   :  { %v259_v62 = vsel %vm172_vm1, %v257_v60, 0.0  ;;  %v211_v5 = vpop.xlane.xlu2 %210 }
 0x1a6   :  { %248 = vadd.xlane.f32.xlu0 %v247_v61  ;;  %260 = vadd.xlane.f32.xlu1 %v259_v62 }
 0x1ac   :  { %v263_v0 = vpop.permute.xlu0 %262 }
 0x1ad   :  { %v265_v3 = vsel %vm172_vm1, %v263_v0, 0.0  ;;  %v749_v7 = vpop.xlane.xlu2 %242 }
 0x1ae   :  { %272 = vadd.xlane.f32.xlu0 %v271_v1  ;;  %254 = vadd.xlane.f32.xlu1 %v253_v2  ;;  %v781_v2 = vstv %s765_s10 }
 0x1af   :  { %266 = vadd.xlane.f32.xlu2 %v265_v3 }
 0x1c6   :  { %v183_v6 = vpop.xlane.xlu1 %182 }
 0x1c7   :  { %v323_v13 = vmax.f32 %v183_v6, %v211_v5 }
 0x1d0   :  { %v204_v8 = vpop.xlane.xlu1 %203 }
 0x1d1   :  { %v274_v25 = vmax.f32 %v736_v42, %v204_v8 }
 0x1d7   :  { %v751_v9 = vpop.xlane.xlu0 %196 }
 0x200   :  { %v753_v10 = vpop.xlane.xlu2 %224 }
 0x201   :  { %v218_v11 = vpop.xlane.xlu1 %217  ;;  %v415_v30 = vmax.f32 %v751_v9, %v753_v10 }
 0x202   :  { %v369_v23 = vmax.f32 %v190_v4, %v218_v11 }
 0x204   :  { %v370_v33 = vmax.f32 %v369_v23, %v749_v7 }
 0x209   :  { %v231_v18 = vpop.xlane.xlu2 %230 }
 0x20a   :  { %v275_v29 = vmax.f32 %v274_v25, %v231_v18 }
 0x211   :  { %v237_v12 = vpop.xlane.xlu0 %236 }
 0x212   :  { %v324_v14 = vmax.f32 %v323_v13, %v237_v12 }
 0x219   :  { %v261_v15 = vpop.xlane.xlu1 %260  ;;  %v755_v16 = vpop.xlane.xlu0 %248 }
 0x21a   :  { %v325_v19 = vmax.f32 %v324_v14, %v261_v15  ;;  %v416_v37 = vmax.f32 %v415_v30, %v755_v16 }
 0x21c   :  { %v326_v20 = vsub.f32 %v183_v6, %v325_v19  ;;  %v329_v21 = vsub.f32 %v211_v5, %v325_v19  ;;  %v332_v22 = vsub.f32 %v237_v12, %v325_v19  ;;  %v335_v24 = vsub.f32 %v261_v15, %v325_v19 }
 0x21d   :  { %v784_v5 = vstv %s767_s11 }
 0x21e   :  { %v327_v26 = vmul.f32 1.442695, %v326_v20  ;;  %v330_v27 = vmul.f32 1.442695, %v329_v21  ;;  %v333_v28 = vmul.f32 1.442695, %v332_v22 }
 0x21f   :  { %v336_v31 = vmul.f32 1.442695, %v335_v24 }
 0x220   :  { %501 = vpow2.f32 %v327_v26 }
 0x221   :  { %503 = vpow2.f32 %v330_v27  ;;  %v255_v32 = vpop.xlane.xlu1 %254  ;;  %v273_v36 = vpop.xlane.xlu0 %272 }
 0x222   :  { %v276_v34 = vmax.f32 %v275_v29, %v255_v32  ;;  %v267_v35 = vpop.xlane.xlu2 %266  ;;  %505 = vpow2.f32 %v333_v28  ;;  %v417_v46 = vmax.f32 %v416_v37, %v273_v36 }
 0x223   :  { %v371_v38 = vmax.f32 %v370_v33, %v267_v35  ;;  %507 = vpow2.f32 %v336_v31 }
 0x224   :  { %v277_v39 = vsub.f32 %v736_v42, %v276_v34  ;;  %v280_v40 = vsub.f32 %v204_v8, %v276_v34  ;;  %v283_v41 = vsub.f32 %v231_v18, %v276_v34  ;;  %v286_v43 = vsub.f32 %v255_v32, %v276_v34 }
 0x225   :  { %v372_v44 = vsub.f32 %v190_v4, %v371_v38  ;;  %v375_v45 = vsub.f32 %v218_v11, %v371_v38  ;;  %v378_v53 = vsub.f32 %v749_v7, %v371_v38  ;;  %v381_v55 = vsub.f32 %v267_v35, %v371_v38 }
 0x226   :  { %v502_v47 = vpop.eup %501  ;;  %v278_v48 = vmul.f32 1.442695, %v277_v39  ;;  %v281_v49 = vmul.f32 1.442695, %v280_v40  ;;  %v284_v50 = vmul.f32 1.442695, %v283_v41  ;;  %v418_v58 = vsub.f32 %v751_v9, %v417_v46 }
 0x227   :  { %v504_v51 = vpop.eup %503  ;;  %v287_v52 = vmul.f32 1.442695, %v286_v43  ;;  %v373_v54 = vmul.f32 1.442695, %v372_v44  ;;  %v376_v57 = vmul.f32 1.442695, %v375_v45  ;;  %v421_v60 = vsub.f32 %v753_v10, %v417_v46 }
 0x228   :  { %v339_v42 = vadd.f32 %v504_v51, %v502_v47  ;;  %509 = vpow2.f32 %v278_v48  ;;  %v506_v56 = vpop.eup %505  ;;  %v379_v62 = vmul.f32 1.442695, %v378_v53  ;;  %v424_v63 = vsub.f32 %v755_v16, %v417_v46 }
 0x229   :  { %511 = vpow2.f32 %v281_v49  ;;  %v774_v61 = vpop.eup %507  ;;  %v382_v1 = vmul.f32 1.442695, %v381_v55  ;;  %v419_v3 = vmul.f32 1.442695, %v418_v58  ;;  %v427_v4 = vsub.f32 %v273_v36, %v417_v46 }
 0x22a   :  { %v342_v59 = vadd.f32 %v506_v56, %v339_v42  ;;  %513 = vpow2.f32 %v284_v50  ;;  %v787_v7 = vstv %s761_s9  ;;  %v422_v8 = vmul.f32 1.442695, %v421_v60 }
 0x22b   :  { %515 = vpow2.f32 %v287_v52  ;;  %v425_v10 = vmul.f32 1.442695, %v424_v63  ;;  %v791_v11 = vstv %s770_s12  ;;  %v338_v15 = vmul.f32 %v502_v47, %v781_v2  ;;  %v168_v47 = vpop.f32.mrf.mxu2 }
 0x22c   :  { %v778_v0 = vadd.f32 %v774_v61, %v342_v59  ;;  %517 = vpow2.f32 %v373_v54  ;;  %v340_v16 = vmul.f32 %v504_v51, %v784_v5  ;;  %v428_v19 = vmul.f32 1.442695, %v427_v4 }
 0x22d   :  { %519 = vpow2.f32 %v376_v57  ;;  %v343_v37 = vmul.f32 %v506_v56, %v791_v11  ;;  %v103_v43 = vperm.slane %v710_v17, 2  ;;  %v346_v17 = vmul.f32 %v774_v61, %v787_v7 }
 0x22e   :  { %v510_v6 = vpop.eup %509  ;;  %521 = vrcp.f32 %v778_v0  ;;  %v341_v31 = vadd.f32 %v340_v16, %v338_v15  ;;  %v357_v44 = vand.u32 2147483647, %v778_v0  ;;  %v359_v45 = vand.u32 2147483648, %v778_v0 }
 0x22f   :  { %v512_v9 = vpop.eup %511  ;;  %523 = vpow2.f32 %v379_v62  ;;  %v291_v12 = vmul.f32 %v510_v6, %v781_v2  ;;  %vm353_vm3 = vweird.f32 %v778_v0  ;;  %v819_v56 = vadd.f32 %v168_v47, %v103_v43 }
 0x230   :  { %v514_v13 = vpop.eup %513  ;;  %v292_v14 = vadd.f32 %v512_v9, %v510_v6  ;;  %525 = vpow2.f32 %v382_v1  ;;  %v295_v20 = vmul.f32 %v512_v9, %v784_v5  ;;  %v344_v48 = vadd.f32 %v343_v37, %v341_v31 }
 0x231   :  { %v516_v18 = vpop.eup %515  ;;  %527 = vpow2.f32 %v419_v3  ;;  %v300_v21 = vmul.f32 %v514_v13, %v791_v11  ;;  %vm358_vm5 = vcmp.eq.f32.partialorder %v357_v44, 8.507059e+37  ;;  %v360_v57 = vor.u32 1.1754944e-38, %v359_v45 }
 0x232   :  { %v518_v22 = vpop.eup %517  ;;  %v297_v23 = vadd.f32 %v514_v13, %v292_v14  ;;  %529 = vpow2.f32 %v422_v8  ;;  %v305_v24 = vmul.f32 %v516_v18, %v787_v7  ;;  %v296_v26 = vadd.f32 %v295_v20, %v291_v12 }
 0x233   :  { %v520_v25 = vpop.eup %519  ;;  %531 = vpow2.f32 %v425_v10  ;;  %v384_v51 = vmul.f32 %v518_v22, %v781_v2  ;;  %v347_v59 = vadd.f32 %v346_v17, %v344_v48  ;;  %v462_v17 = vstv %s490_s13 }
 0x234   :  { %v522_v27 = vpop.eup %521  ;;  %v799_v28 = vadd.f32 %v516_v18, %v297_v23  ;;  %v385_v29 = vadd.f32 %v520_v25, %v518_v22  ;;  %533 = vpow2.f32 %v428_v19  ;;  %v301_v33 = vadd.f32 %v300_v21, %v296_v26 }
 0x235   :  { %v524_v30 = vpop.eup %523  ;;  %v349_v32 = vmul.f32 %v522_v27, %v778_v0  ;;  %vm354_vm2 = vweird.f32 %v522_v27  ;;  %v386_v52 = vmul.f32 %v520_v25, %v784_v5 }
 0x236   :  { %v526_v34 = vpop.eup %525  ;;  %535 = vrcp.f32 %v799_v28  ;;  %v388_v35 = vadd.f32 %v524_v30, %v385_v29  ;;  %v804_v39 = vadd.f32 %v305_v24, %v301_v33  ;;  %vm355_vm4 = vmor %vm353_vm3, %vm354_vm2  ;;  %v389_v0 = vmul.f32 %v524_v30, %v791_v11 }
 0x237   :  { %v528_v36 = vpop.eup %527  ;;  %v350_v38 = vsub.f32 1.0, %v349_v32  ;;  %v387_v1 = vadd.f32 %v386_v52, %v384_v51  ;;  %v318_v12 = vand.u32 2147483648, %v799_v28  ;;  %v316_v15 = vand.u32 2147483647, %v799_v28 }
 0x238   :  { %v530_v40 = vpop.eup %529  ;;  %v806_v41 = vadd.f32 %v526_v34, %v388_v35  ;;  %v430_v4 = vmul.f32 %v528_v36, %v781_v2  ;;  %v392_v16 = vmul.f32 %v526_v34, %v787_v7  ;;  %vm312_vm7 = vweird.f32 %v799_v28 }
 0x239   :  { %v431_v46 = vadd.f32 %v530_v40, %v528_v36  ;;  %v351_v49 = vmul.f32 %v522_v27, %v350_v38  ;;  %v532_v50 = vpop.eup %531  ;;  %v432_v10 = vmul.f32 %v530_v40, %v784_v5  ;;  %v390_v13 = vadd.f32 %v389_v0, %v387_v1 }
 0x23a   :  { %537 = vrcp.f32 %v806_v41  ;;  %v814_v53 = vpop.eup %533  ;;  %v403_v2 = vand.u32 2147483647, %v806_v41  ;;  %v405_v19 = vand.u32 2147483648, %v806_v41  ;;  %v319_v23 = vor.u32 1.1754944e-38, %v318_v12 }
 0x23b   :  { %v434_v42 = vadd.f32 %v532_v50, %v431_v46  ;;  %v352_v54 = vadd.f32 %v522_v27, %v351_v49  ;;  %v433_v22 = vadd.f32 %v432_v10, %v430_v4  ;;  %v393_v24 = vadd.f32 %v392_v16, %v390_v13 }
 0x23c   :  { %v536_v55 = vpop.eup %535  ;;  %vm317_vm10 = vcmp.eq.f32.partialorder %v316_v15, 8.507059e+37  ;;  %vm399_vm11 = vweird.f32 %v806_v41  ;;  %v435_v29 = vmul.f32 %v532_v50, %v791_v11  ;;  %vm404_vm13 = vcmp.eq.f32.partialorder %v403_v2, 8.507059e+37 }
 0x23d   :  { %v822_v58 = vadd.f32 %v814_v53, %v434_v42  ;;  %v356_v60 = vsel %vm355_vm4, %v522_v27, %v352_v54  ;;  %v308_v62 = vmul.f32 %v536_v55, %v799_v28  ;;  %vm313_vm6 = vweird.f32 %v536_v55 }
 0x23e   :  { %v361_v63 = vsel %vm358_vm5, %v360_v57, %v356_v60  ;;  %vm314_vm9 = vmor %vm312_vm7, %vm313_vm6  ;;  %v406_v28 = vor.u32 1.1754944e-38, %v405_v19  ;;  %v436_v34 = vadd.f32 %v435_v29, %v433_v22  ;;  %v438_v11 = vmul.f32 %v814_v53, %v787_v7 }
 0x23f   :  { %539 = vrcp.f32 %v822_v58  ;;  %v362_v61 = vmul.f32 %v361_v63, %v347_v59  ;;  %v309_v6 = vsub.f32 1.0, %v308_v62  ;;  %v449_v35 = vand.u32 2147483647, %v822_v58 }
 0x240   :  { %v538_v3 = vpop.eup %537  ;;  %v451_v36 = vand.u32 2147483648, %v822_v58  ;;  %vm445_vm15 = vweird.f32 %v822_v58  ;;  %v439_v45 = vadd.f32 %v438_v11, %v436_v34 }
 0x241   :  { %v363_v8 = vmul.f32 %v362_v61, %v819_v56  ;;  %v395_v9 = vmul.f32 %v538_v3, %v806_v41  ;;  %v310_v14 = vmul.f32 %v536_v55, %v309_v6  ;;  %vm400_vm8 = vweird.f32 %v538_v3 }
 0x242   :  { %vm401_vm12 = vmor %vm399_vm11, %vm400_vm8  ;;  %v452_v44 = vor.u32 1.1754944e-38, %v451_v36  ;;  %vm450_vm2 = vcmp.eq.f32.partialorder %v449_v35, 8.507059e+37 }
 0x243   :  { %365 = vrot.lane.b32.xlu2 %v363_v8, %s665_s8  ;;  %v396_v18 = vsub.f32 1.0, %v395_v9  ;;  %v311_v20 = vadd.f32 %v536_v55, %v310_v14 }
 0x245   :  { %v540_v5 = vpop.eup %539  ;;  %v397_v21 = vmul.f32 %v538_v3, %v396_v18  ;;  %v315_v26 = vsel %vm314_vm9, %v536_v55, %v311_v20 }
 0x246   :  { %v441_v25 = vmul.f32 %v540_v5, %v822_v58  ;;  %v320_v30 = vsel %vm317_vm10, %v319_v23, %v315_v26  ;;  %vm446_vm14 = vweird.f32 %v540_v5 }
 0x247   :  { %v398_v27 = vadd.f32 %v538_v3, %v397_v21  ;;  %v321_v32 = vmul.f32 %v320_v30, %v804_v39  ;;  %vm447_vm0 = vmor %vm445_vm15, %vm446_vm14 }
 0x248   :  { %v442_v31 = vsub.f32 1.0, %v441_v25 }
 0x249   :  { %v402_v33 = vsel %vm401_vm12, %v538_v3, %v398_v27  ;;  %v322_v40 = vmul.f32 %v321_v32, %v819_v56 }
 0x24a   :  { %v407_v37 = vsel %vm404_vm13, %v406_v28, %v402_v33  ;;  %v443_v38 = vmul.f32 %v540_v5, %v442_v31 }
 0x24b   :  { %v408_v41 = vmul.f32 %v407_v37, %v393_v24 }
 0x24c   :  { %v444_v43 = vadd.f32 %v540_v5, %v443_v38 }
 0x24d   :  { %v409_v39 = vmul.f32 %v408_v41, %v819_v56 }
 0x24e   :  { %v448_v46 = vsel %vm447_vm0, %v540_v5, %v444_v43 }
 0x24f   :  { %411 = vrot.lane.b32.xlu0 %v409_v39, %s664_s3  ;;  %v453_v47 = vsel %vm450_vm2, %v452_v44, %v448_v46 }
 0x250   :  { %v454_v48 = vmul.f32 %v453_v47, %v439_v45 }
 0x252   :  { %v455_v49 = vmul.f32 %v454_v48, %v819_v56 }
 0x254   :  { %457 = vrot.lane.b32.xlu1 %v455_v49, %s663_s2 }
 0x29d   :  { %v366_v50 = vpop.permute.xlu2 %365 }
 0x29e   :  { %v368_v7 = vadd.f32 %v366_v50, %v322_v40 }
 0x2c1   :  { %v412_v51 = vpop.permute.xlu0 %411 }
 0x2c2   :  { %v414_v52 = vadd.f32 %v412_v51, %v368_v7 }
 0x2c6   :  { %v458_v53 = vpop.permute.xlu1 %457 }
 0x2c7   :  { %v460_v42 = vadd.f32 %v458_v53, %v414_v52 }
 0x2c9   :  { %v463_v54 = vadd.f32 %v462_v17, %v460_v42 }
 0x2cb   :  { %464 = vst.msk [vmem:[#allocation10] sm:$0x3] %vm172_vm1, %v463_v54 }
 0x2cc   :  { %475 = dma.vmem_to_hbm [thread:$0]  %s471_s15, 32, %s473_s18, [#allocation4]  }
 0x2cd   :  { %655 = dma.done.wait [#allocation4], 32  }
 0x2ce   :  { %656 = vsyncadd [#allocation4], 4294967264 }
 0x2cf   :  { %480 = vsyncpa [#allocation3], 1 }
 0x2d0   :  { %481 = vsyncpa [#allocation7], 1 }
 0x2d1   :  { %482 = vsyncpa [#allocation4], 1 }
 0x2d2   :  { %483 = vsyncpa [#allocation5], 1 }

</bundles_post_ra>
